<compile_context>
chip_gen: v7x
topology: tpu7x:2x2x1
jax: 0.10.0
libtpu: 0.0.40
codegen_flags: <defaults>
</compile_context>

<pallas_src>
import jax
import jax.numpy as jnp
from jax.experimental import pallas as pl
from jax.experimental.pallas import tpu as pltpu


def _vmem_capacity_bytes():
    """Physical VMEM per TensorCore; conservative (v7x) fallback if unqueryable."""
    try:
        v = getattr(pltpu.get_tpu_info(), "vmem_capacity_bytes", None)
        if isinstance(v, int) and v > 0:
            return v
    except Exception:
        pass
    return 64 * 1024 * 1024


def _num_tensorcores():
    """TensorCores addressable by one pallas_call (megacore sharding via 'parallel')."""
    try:
        info = pltpu.get_tpu_info()
        for attr in ("num_cores", "core_count", "tensorcores_per_chip", "num_tensorcores"):
            v = getattr(info, attr, None)
            if isinstance(v, int) and 0 < v <= 8:
                return v
    except Exception:
        pass
    try:
        kind = jax.devices()[0].device_kind.lower()
        if "v7" in kind:
            return 2
    except Exception:
        pass
    return 1


def _se_chan_kernel(x_ref, w1t_ref, w2t_ref, o_ref):
    # x_ref:  (bb, C, S) block (bb batch rows, S = T*F spatial positions)
    # w1t_ref: (C, hid)  -- Linear(C -> hid).weight transposed
    # w2t_ref: (hid, C)  -- Linear(hid -> C).weight transposed
    x = x_ref[...]
    inv_s = jnp.float32(1.0 / x_ref.shape[-1])

    # Global average pool over spatial positions with f32 accumulation -> (bb, C).
    pooled = jnp.sum(x, axis=-1, dtype=jnp.float32) * inv_s

    # Batched FC for the whole block: Linear -> ReLU -> Linear -> Sigmoid.
    h = jnp.dot(pooled, w1t_ref[...], preferred_element_type=jnp.float32)   # (bb, hid)
    h = jnp.maximum(h, 0.0)
    scale = jax.nn.sigmoid(
        jnp.dot(h, w2t_ref[...], preferred_element_type=jnp.float32))       # (bb, C)

    # Multiply in f32 and cast once on the store (matches the reference ordering).
    o_ref[...] = (x.astype(jnp.float32) * scale[:, :, None]).astype(o_ref.dtype)


def se_layer_chan(x, w1, w2, *, donate_x=False):
    """SE ('chan') forward.

    x:  (B, C, T, F) NCHW activations.
    w1: (hid, C)  -- Linear(C -> hid).weight (PyTorch layout, no bias)
    w2: (C, hid)  -- Linear(hid -> C).weight (PyTorch layout, no bias)
    donate_x: alias x's buffer to the output (only if x is dead after this op).
    """
    b, c, t, f = x.shape
    hid = w1.shape[0]
    s = t * f
    x3 = x.reshape(b, c, s)

    # Pre-transpose the tiny weight matrices once (plain XLA, outside the kernel).
    w1t = jnp.transpose(w1)   # (C, hid)
    w2t = jnp.transpose(w2)   # (hid, C)

    # ---- batch-block sizing (generation aware) ----------------------------------
    itemsize = x3.dtype.itemsize
    per_b_bytes = c * s * itemsize                          # one batch row (in OR out)
    w_bytes = 2 * c * hid * w1.dtype.itemsize               # both weight matrices
    overhead = 2 * w_bytes + (1 << 20)                      # dbl-buffered weights + scratch slack
    vmem_budget = _vmem_capacity_bytes() * 3 // 4

    # 2x double-buffering on both the input and output x blocks.
    bb_fit = max(1, (vmem_budget - overhead) // (4 * per_b_bytes))
    n_cores = _num_tensorcores()
    bb = max(1, min(b, bb_fit, pl.cdiv(b, n_cores)))
    grid = (pl.cdiv(b, bb),)

    needed = 4 * bb * per_b_bytes + overhead
    cp_kwargs = dict(dimension_semantics=("parallel",))
    if needed > 12 * 1024 * 1024:
        # Never set the limit below the actual requirement; cap at the budget.
        cp_kwargs["vmem_limit_bytes"] = int(min(vmem_budget, needed * 3 // 2))

    cost = pl.CostEstimate(
        flops=int(2 * b * c * s + 4 * b * c * hid),
        transcendentals=int(b * c),
        bytes_accessed=int(2 * b * c * s * itemsize + 2 * w_bytes),
    )

    kwargs = {}
    if donate_x:
        kwargs["input_output_aliases"] = {0: 0}

    out = pl.pallas_call(
        _se_chan_kernel,
        out_shape=jax.ShapeDtypeStruct((b, c, s), x.dtype),
        grid=grid,
        in_specs=[
            pl.BlockSpec((bb, c, s), lambda i: (i, 0, 0)),   # lane-dense (bb, C, S) tile
            pl.BlockSpec((c, hid), lambda i: (0, 0)),        # resident weights
            pl.BlockSpec((hid, c), lambda i: (0, 0)),
        ],
        out_specs=pl.BlockSpec((bb, c, s), lambda i: (i, 0, 0)),
        compiler_params=pltpu.CompilerParams(**cp_kwargs),
        cost_estimate=cost,
        **kwargs,
    )(x3, w1t, w2t)
    return out.reshape(b, c, t, f)


def _reference(x, w1, w2):
    # Pure-JAX reference mirroring the PyTorch forward.
    y = jnp.mean(x.astype(jnp.float32), axis=(2, 3))                 # (B, C)
    y = jnp.maximum(y @ w1.astype(jnp.float32).T, 0.0)               # (B, hid)
    y = jax.nn.sigmoid(y @ w2.astype(jnp.float32).T)                 # (B, C)
    return (x.astype(jnp.float32) * y[:, :, None, None]).astype(x.dtype)


if __name__ == "__main__":
    # KWSConvMixer uses SELayer(dim=feat_dim=64, reduction=4, attend_dim='chan') on
    # activations of shape (B, feat_dim, T, 1).
    B, C, T, F = 4, 64, 128, 1
    HID = max(C // 4, 4)   # = 16

    key = jax.random.PRNGKey(0)
    kx, k1, k2 = jax.random.split(key, 3)
    x = jax.random.normal(kx, (B, C, T, F), dtype=jnp.float32)
    # PyTorch Linear.weight layout (out_features, in_features), bias=False.
    w1 = 0.1 * jax.random.normal(k1, (HID, C), dtype=jnp.float32)    # Linear(C -> HID)
    w2 = 0.1 * jax.random.normal(k2, (C, HID), dtype=jnp.float32)    # Linear(HID -> C)

    out = jax.block_until_ready(se_layer_chan(x, w1, w2))
    ref = _reference(x, w1, w2)
    assert out.shape == (B, C, T, F)
    assert jnp.allclose(out, ref, atol=1e-5, rtol=1e-5)

    # bf16 activation path: pooling still accumulates in f32; multiply in f32, cast on store.
    x_bf16 = x.astype(jnp.bfloat16)
    out_bf16 = jax.block_until_ready(se_layer_chan(x_bf16, w1, w2))
    ref_bf16 = _reference(x_bf16, w1, w2)
    assert out_bf16.dtype == jnp.bfloat16
    assert jnp.allclose(out_bf16.astype(jnp.float32),
                        ref_bf16.astype(jnp.float32), atol=5e-2, rtol=5e-2)

    print("KERNEL_OK")
</pallas_src>

<mosaic_0001>
module attributes {stable_mosaic.version = 11 : i64} {
  func.func @_se_chan_kernel(%arg0: i32, %arg1: memref<4x64x128xf32, #tpu.memory_space<vmem>>, %arg2: memref<64x16xf32, #tpu.memory_space<vmem>>, %arg3: memref<16x64xf32, #tpu.memory_space<vmem>>, %arg4: memref<4x64x128xf32, #tpu.memory_space<vmem>>) attributes {dimension_semantics = [#tpu.dimension_semantics<parallel>], iteration_bounds = array<i64: 1>, scalar_prefetch = 0 : i64, scratch_operands = 0 : i64, tpu.core_type = #tpu.core_type<tc>, window_params = [{transform_indices = @transform_0, window_bounds = array<i64: 4, 64, 128>}, {pipeline_mode = #tpu.pipeline_mode<synchronous>, transform_indices = @transform_1, window_bounds = array<i64: 64, 16>}, {pipeline_mode = #tpu.pipeline_mode<synchronous>, transform_indices = @transform_2, window_bounds = array<i64: 16, 64>}, {transform_indices = @transform_3, window_bounds = array<i64: 4, 64, 128>}]} {
    %c0 = arith.constant 0 : index
    %c0_0 = arith.constant 0 : index
    %c0_1 = arith.constant 0 : index
    %0 = vector.load %arg1[%c0, %c0_0, %c0_1] : memref<4x64x128xf32, #tpu.memory_space<vmem>>, vector<4x64x128xf32>
    %cst = arith.constant dense<0.000000e+00> : vector<4x64xf32>
    %1 = vector.multi_reduction <add>, %0, %cst [2] : vector<4x64x128xf32> to vector<4x64xf32>
    %cst_2 = arith.constant 7.812500e-03 : f32
    %2 = vector.broadcast %cst_2 : f32 to vector<4x64xf32>
    %3 = arith.mulf %1, %2 : vector<4x64xf32>
    %c0_3 = arith.constant 0 : index
    %c0_4 = arith.constant 0 : index
    %4 = vector.load %arg2[%c0_3, %c0_4] : memref<64x16xf32, #tpu.memory_space<vmem>>, vector<64x16xf32>
    %cst_5 = arith.constant dense<0.000000e+00> : vector<4x16xf32>
    %5 = tpu.matmul %3, %4, %cst_5 {dimension_numbers = #tpu.dot_dimension_numbers<[1], [0], [0], [1], [0, 0, 1, 1], [], []>} : vector<4x64xf32>, vector<64x16xf32>, vector<4x16xf32> -> vector<4x16xf32>
    %cst_6 = arith.constant 0.000000e+00 : f32
    %6 = vector.broadcast %cst_6 : f32 to vector<4x16xf32>
    %7 = arith.maximumf %5, %6 : vector<4x16xf32>
    %c0_7 = arith.constant 0 : index
    %c0_8 = arith.constant 0 : index
    %8 = vector.load %arg3[%c0_7, %c0_8] : memref<16x64xf32, #tpu.memory_space<vmem>>, vector<16x64xf32>
    %cst_9 = arith.constant dense<0.000000e+00> : vector<4x64xf32>
    %9 = tpu.matmul %7, %8, %cst_9 {dimension_numbers = #tpu.dot_dimension_numbers<[1], [0], [0], [1], [0, 0, 1, 1], [], []>} : vector<4x16xf32>, vector<16x64xf32>, vector<4x64xf32> -> vector<4x64xf32>
    %10 = arith.negf %9 : vector<4x64xf32>
    %11 = math.exp %10 : vector<4x64xf32>
    %cst_10 = arith.constant 1.000000e+00 : f32
    %12 = vector.broadcast %cst_10 : f32 to vector<4x64xf32>
    %13 = arith.addf %12, %11 : vector<4x64xf32>
    %14 = arith.divf %12, %13 : vector<4x64xf32>
    %15 = vector.shape_cast %14 : vector<4x64xf32> to vector<4x64x1xf32>
    %16 = vector.broadcast %15 : vector<4x64x1xf32> to vector<4x64x128xf32>
    %17 = arith.mulf %0, %16 : vector<4x64x128xf32>
    %c0_11 = arith.constant 0 : index
    %c0_12 = arith.constant 0 : index
    %c0_13 = arith.constant 0 : index
    %18 = vector.load %arg4[%c0_11, %c0_12, %c0_13] : memref<4x64x128xf32, #tpu.memory_space<vmem>>, vector<4x64x128xf32>
    tpu.vector_store %arg4[%c0_11, %c0_12, %c0_13], %17 {strides = array<i32>} : memref<4x64x128xf32, #tpu.memory_space<vmem>>, vector<4x64x128xf32>,
    return
  }
  func.func @transform_0(%arg0: i32) -> (i32, i32, i32) {
    %c0_i32 = arith.constant 0 : i32
    %c0_i32_0 = arith.constant 0 : i32
    %c0_i32_1 = arith.constant 0 : i32
    return %arg0, %c0_i32, %c0_i32_0 : i32, i32, i32
  }
  func.func @transform_1(%arg0: i32) -> (i32, i32) {
    %c0_i32 = arith.constant 0 : i32
    %c0_i32_0 = arith.constant 0 : i32
    %c0_i32_1 = arith.constant 0 : i32
    return %c0_i32, %c0_i32_0 : i32, i32
  }
  func.func @transform_2(%arg0: i32) -> (i32, i32) {
    %c0_i32 = arith.constant 0 : i32
    %c0_i32_0 = arith.constant 0 : i32
    %c0_i32_1 = arith.constant 0 : i32
    return %c0_i32, %c0_i32_0 : i32, i32
  }
  func.func @transform_3(%arg0: i32) -> (i32, i32, i32) {
    %c0_i32 = arith.constant 0 : i32
    %c0_i32_0 = arith.constant 0 : i32
    %c0_i32_1 = arith.constant 0 : i32
    return %arg0, %c0_i32, %c0_i32_0 : i32, i32, i32
  }
}

</mosaic_0001>

<bundles_post_ra>
// kernel: tpu_custom_call.1
= control target key start
LH: loop header
LB: loop body
LE: loop exit
PB: predicated region body
PF: predicated region fallthrough
CT: control target
= control target key end

     0   :  { %8 = vsyncpa [#allocation3], 0  ;;  %s1192_s0 = inlined_call_operand.hbm [shape: f32[4,64,128], index: 0, kind: input, shape index: {}]   ;;  %s1193_s1 = inlined_call_operand.vmem [shape: f32[64,16], index: 1, kind: input, shape index: {}]   ;;  %s1194_s2 = inlined_call_operand.vmem [shape: f32[16,64], index: 2, kind: input, shape index: {}]   ;;  %s1195_s3 = inlined_call_operand.hbm [shape: f32[4,64,128], index: 3, kind: output, shape index: {}]  }
   0x1   :  { %9 = vsyncpa [#allocation4], 0  ;;  %s867_s12 = smov [#allocation2]   ;;  %s819_s16 = scalar_lea.hbm %s1192_s0, 4096 }
   0x2   :  { %s15_s13 = sshll.u32 %s867_s12, 4  ;;  %p820_p0 = scmp.ne.s32.totalorder %s1192_s0, %s819_s16  ;;  %s16_s13 = int_to_ptr.vmem [resolvable:$true] %s15_s13 }
   0x3   :  { %p823_p1 = scmp.lt.u32.totalorder %s819_s16, %s1192_s0 }
   0x5   :  { %p825_p2 = pnand %p823_p1, %p820_p0 }
   0x7   :  { %828 = shalt.err (!%p825_p2)
}
   0x8   :  { %s829_s21 = scalar_lea.vmem %s16_s13, 4096  ;;  %p834_p4 = scmp.lt.s32.totalorder %s16_s13, %s16_s13 }
   0x9   :  { %p830_p3 = scmp.ne.s32.totalorder %s16_s13, %s829_s21  ;;  %p835_p5 = scmp.lt.s32.totalorder %s829_s21, %s829_s21 }
   0xb   :  { %p836_p6 = por %p835_p5, %p834_p4 }
   0xd   :  { %p837_p7 = pnand %p836_p6, %p830_p3 }
   0xf   :  { %840 = shalt.err (!%p837_p7)
}
  0x10   :  { %s868_s22 = smov 128   ;;  %s869_s23 = smov 8  }
  0x11   :  { %21 = dma.hbm_to_vmem [thread:$0]  %s1192_s0, 4096, %s16_s13, [#allocation3], %s868_s22, %s868_s22, %s869_s23  }
  0x12   :  { %863 = dma.done.wait [#allocation3], 4096  }
  0x13   :  { %864 = vsyncadd [#allocation3], 4294963200  ;;  %v909_v0 = vld [vmem:[#allocation2 + $0x40] sm:$0xff]  ;;  %v915_v2 = vld [vmem:[#allocation2 + $0x48] sm:$0xff]  ;;  %v870_v35 = vmov 0.0|0.0   ;;  %vm871_vm0 = vmmov 0   ;;  %v197_v62 = vlaneseq }
  0x14   :  { %v911_v1 = vld [vmem:[#allocation2] sm:$0xff]  ;;  %77 = vadd.xlane.f32.xlu1 %v909_v0  ;;  %v917_v3 = vld [vmem:[#allocation2 + $0x8] sm:$0xff]  ;;  %v921_v4 = vld [vmem:[#allocation2 + $0x50] sm:$0xff]  ;;  %793 = vmatprep.subr.bf16.mxu0 %v870_v35  ;;  %v872_v45 = vmov 0.0   ;;  %vm208_vm1 = vcmask 130112   ;;  %vm215_vm2 = vcmask 195712  }
  0x15   :  { %61 = vadd.xlane.f32.xlu0 %v911_v1  ;;  %v923_v5 = vld [vmem:[#allocation2 + $0x10] sm:$0xff]  ;;  %v927_v6 = vld [vmem:[#allocation2 + $0x88] sm:$0xff]  ;;  %v929_v7 = vld [vmem:[#allocation2 + $0x80] sm:$0xff]  ;;  %805 = vmatprep.subr.bf16.mxu1 %v870_v35  ;;  %vm222_vm3 = vcmask 261312   ;;  %vm229_vm4 = vcmask 326912   ;;  %vm236_vm5 = vcmask 392512  }
  0x16   :  { %v933_v8 = vld [vmem:[#allocation2 + $0x58] sm:$0xff]  ;;  %v939_v10 = vld [vmem:[#allocation2 + $0xc0] sm:$0xff]  ;;  %v941_v11 = vld [vmem:[#allocation2 + $0x90] sm:$0xff]  ;;  %783 = vmatprep.mubr.msk.f32.mxu0 %vm871_vm0, %v872_v45  ;;  %790 = vmatprep.mubr.msk.f32.mxu1 %vm871_vm0, %v872_v45  ;;  %vm243_vm6 = vcmask 458112   ;;  %vm250_vm7 = vcmask 523712   ;;  %vm369_vm8 = vcmask 1041409  }
  0x17   :  { %v935_v9 = vld [vmem:[#allocation2 + $0x18] sm:$0xff]  ;;  %1209 = vst [vmem:[#allocation8_spill] sm:$0xff] %v939_v10  ;;  %v945_v12 = vld [vmem:[#allocation2 + $0x20] sm:$0xff]  ;;  %v947_v13 = vld [vmem:[#allocation2 + $0xc8] sm:$0xff]  ;;  %vm371_vm9 = vcmask 1042434   ;;  %vm373_vm10 = vcmask 1043459  }
  0x18   :  { %79 = vadd.xlane.f32.xlu1 %v915_v2  ;;  %1210 = vst [vmem:[#allocation9_spill] sm:$0xff] %v947_v13  ;;  %v951_v14 = vld [vmem:[#allocation2 + $0x98] sm:$0xff]  ;;  %v953_v15 = vld [vmem:[#allocation2 + $0x60] sm:$0xff]  ;;  %v957_v16 = vld [vmem:[#allocation2 + $0x28] sm:$0xff]  ;;  %vm375_vm11 = vcmask 523264   ;;  %vm451_vm12 = vcmask 130048  }
  0x19   :  { %63 = vadd.xlane.f32.xlu0 %v917_v3  ;;  %1211 = vst [vmem:[#allocation10_spill] sm:$0xff] %v951_v14  ;;  %v959_v17 = vld [vmem:[#allocation2 + $0xd0] sm:$0xff]  ;;  %v963_v18 = vld [vmem:[#allocation2 + $0xa0] sm:$0xff]  ;;  %v965_v19 = vld [vmem:[#allocation2 + $0x68] sm:$0xff] }
  0x1a   :  { %1212 = vst [vmem:[#allocation11_spill] sm:$0xff] %v959_v17  ;;  %1213 = vst [vmem:[#allocation12_spill] sm:$0xff] %v963_v18  ;;  %v969_v20 = vld [vmem:[#allocation2 + $0x30] sm:$0xff]  ;;  %v971_v21 = vld [vmem:[#allocation2 + $0xd8] sm:$0xff] }
  0x1b   :  { %1214 = vst [vmem:[#allocation13_spill] sm:$0xff] %v971_v21  ;;  %v975_v22 = vld [vmem:[#allocation2 + $0xa8] sm:$0xff]  ;;  %v977_v23 = vld [vmem:[#allocation2 + $0x70] sm:$0xff]  ;;  %v981_v24 = vld [vmem:[#allocation2 + $0x38] sm:$0xff] }
  0x1c   :  { %81 = vadd.xlane.f32.xlu1 %v921_v4  ;;  %1215 = vst [vmem:[#allocation14_spill] sm:$0xff] %v975_v22  ;;  %v983_v25 = vld [vmem:[#allocation2 + $0xe0] sm:$0xff]  ;;  %v987_v26 = vld [vmem:[#allocation2 + $0xb0] sm:$0xff]  ;;  %v989_v27 = vld [vmem:[#allocation2 + $0x78] sm:$0xff] }
  0x1d   :  { %65 = vadd.xlane.f32.xlu0 %v923_v5  ;;  %1216 = vst [vmem:[#allocation15_spill] sm:$0xff] %v983_v25  ;;  %1217 = vst [vmem:[#allocation16_spill] sm:$0xff] %v987_v26  ;;  %v993_v28 = vld [vmem:[#allocation2 + $0xb8] sm:$0xff]  ;;  %v995_v29 = vld [vmem:[#allocation2 + $0xe8] sm:$0xff] }
  0x1e   :  { %1218 = vst [vmem:[#allocation17_spill] sm:$0xff] %v993_v28  ;;  %1219 = vst [vmem:[#allocation18_spill] sm:$0xff] %v995_v29  ;;  %v999_v30 = vld [vmem:[#allocation2 + $0xf0] sm:$0xff]  ;;  %v1001_v31 = vld [vmem:[#allocation2 + $0xf8] sm:$0xff] }
  0x1f   :  { %1220 = vst [vmem:[#allocation19_spill] sm:$0xff] %v999_v30  ;;  %1221 = vst [vmem:[#allocation20_spill] sm:$0xff] %v1001_v31  ;;  %v157_v32 = vld [vmem:[%s1193_s1] sm:$0xff]  ;;  %v158_v33 = vld [vmem:[%s1193_s1 + $0x8] sm:$0xff] }
  0x20   :  { %95 = vadd.xlane.f32.xlu1 %v927_v6  ;;  %v794_v34 = vpack.c.bf16 %v158_v33, %v157_v32  ;;  %v159_v36 = vld [vmem:[%s1193_s1 + $0x10] sm:$0xff]  ;;  %v160_v37 = vld [vmem:[%s1193_s1 + $0x18] sm:$0xff]  ;;  %v161_v39 = vld [vmem:[%s1193_s1 + $0x20] sm:$0xff]  ;;  %v198_v33 = vand.u32 127, %v197_v62 }
  0x21   :  { %93 = vadd.xlane.f32.xlu0 %v929_v7  ;;  %v797_v38 = vpack.c.bf16 %v160_v37, %v159_v36  ;;  %v162_v40 = vld [vmem:[%s1193_s1 + $0x28] sm:$0xff]  ;;  %v163_v42 = vld [vmem:[%s1193_s1 + $0x30] sm:$0xff]  ;;  %v164_v43 = vld [vmem:[%s1193_s1 + $0x38] sm:$0xff] }
  0x22   :  { %795 = vmatpush3.bf16.msra.mxu0 %v794_v34  ;;  %v800_v41 = vpack.c.bf16 %v162_v40, %v161_v39  ;;  %v803_v44 = vpack.c.bf16 %v164_v43, %v163_v42  ;;  %v1033_v34 = vshrl.u32 %v197_v62, 7  ;;  %v210_v36 = vadd.s32 4294967280, %v198_v33 }
  0x23   :  { %796 = vmatprep.subr.bf16.mxu0 %v870_v35  ;;  %v217_v37 = vadd.s32 4294967272, %v198_v33  ;;  %v224_v40 = vadd.s32 4294967264, %v198_v33 }
  0x24   :  { %83 = vadd.xlane.f32.xlu1 %v933_v8 }
  0x25   :  { %67 = vadd.xlane.f32.xlu0 %v935_v9 }
  0x26   :  { %798 = vmatpush3.bf16.msra.mxu0 %v797_v38 }
  0x27   :  { %799 = vmatprep.subr.bf16.mxu0 %v870_v35 }
  0x28   :  { %109 = vadd.xlane.f32.xlu1 %v939_v10 }
  0x29   :  { %97 = vadd.xlane.f32.xlu0 %v941_v11 }
  0x2a   :  { %801 = vmatpush3.bf16.msra.mxu0 %v800_v41  ;;  %v1040_v41 = vsub.s32 %v198_v33, %v1033_v34 }
  0x2b   :  { %802 = vmatprep.subr.bf16.mxu0 %v870_v35  ;;  %v203_v35 = vadd.s32 4294967288, %v198_v33 }
  0x2c   :  { %69 = vadd.xlane.f32.xlu1 %v945_v12 }
  0x2d   :  { %111 = vadd.xlane.f32.xlu0 %v947_v13  ;;  %v1043_v43 = vsub.s32 %v203_v35, %v1033_v34 }
  0x2e   :  { %804 = vmatpush3.bf16.msra.mxu0 %v803_v44  ;;  %v1046_v44 = vsub.s32 %v210_v36, %v1033_v34 }
  0x30   :  { %99 = vadd.xlane.f32.xlu1 %v951_v14 }
  0x31   :  { %85 = vadd.xlane.f32.xlu0 %v953_v15 }
  0x34   :  { %71 = vadd.xlane.f32.xlu1 %v957_v16 }
  0x35   :  { %113 = vadd.xlane.f32.xlu0 %v959_v17 }
  0x38   :  { %101 = vadd.xlane.f32.xlu1 %v963_v18 }
  0x39   :  { %87 = vadd.xlane.f32.xlu0 %v965_v19 }
  0x3c   :  { %73 = vadd.xlane.f32.xlu1 %v969_v20 }
  0x3d   :  { %115 = vadd.xlane.f32.xlu0 %v971_v21 }
  0x40   :  { %103 = vadd.xlane.f32.xlu1 %v975_v22 }
  0x41   :  { %89 = vadd.xlane.f32.xlu0 %v977_v23 }
  0x44   :  { %75 = vadd.xlane.f32.xlu1 %v981_v24 }
  0x45   :  { %117 = vadd.xlane.f32.xlu0 %v983_v25 }
  0x48   :  { %105 = vadd.xlane.f32.xlu1 %v987_v26 }
  0x49   :  { %91 = vadd.xlane.f32.xlu0 %v989_v27 }
  0x4c   :  { %107 = vadd.xlane.f32.xlu1 %v993_v28 }
  0x4d   :  { %119 = vadd.xlane.f32.xlu0 %v995_v29  ;;  %v1049_v29 = vsub.s32 %v217_v37, %v1033_v34  ;;  %v245_v37 = vadd.s32 4294967240, %v198_v33 }
  0x50   :  { %123 = vadd.xlane.f32.xlu1 %v1001_v31 }
  0x51   :  { %121 = vadd.xlane.f32.xlu0 %v999_v30 }
  0xa1   :  { %v78_v46 = vpop.xlane.xlu1 %77 }
  0xa2   :  { %v62_v47 = vpop.xlane.xlu0 %61  ;;  %v133_v42 = vmul.f32 0.0078125, %v78_v46  ;;  %v1056_v46 = vsub.s32 %v224_v40, %v1033_v34 }
  0xa3   :  { %v125_v45 = vmul.f32 0.0078125, %v62_v47 }
  0xa4   :  { %v255_v47 = vrot.slane %v133_v42, %v1040_v41 }
  0xa5   :  { %v80_v48 = vpop.xlane.xlu1 %79  ;;  %v202_v10 = vrot.slane %v125_v45, %v1040_v41 }
  0xa6   :  { %v64_v49 = vpop.xlane.xlu0 %63  ;;  %v134_v62 = vmul.f32 0.0078125, %v80_v48  ;;  %v231_v48 = vadd.s32 4294967256, %v198_v33 }
  0xa7   :  { %v126_v31 = vmul.f32 0.0078125, %v64_v49  ;;  %v238_v49 = vadd.s32 4294967248, %v198_v33 }
  0xa8   :  { %v259_v22 = vrot.slane %v134_v62, %v1043_v43 }
  0xa9   :  { %v82_v50 = vpop.xlane.xlu1 %81 }
  0xaa   :  { %v66_v51 = vpop.xlane.xlu0 %65  ;;  %v135_v25 = vmul.f32 0.0078125, %v82_v50  ;;  %v207_v50 = vrot.slane %v126_v31, %v1043_v43  ;;  %v1069_v31 = vsub.s32 %v231_v48, %v1033_v34 }
  0xab   :  { %v127_v13 = vmul.f32 0.0078125, %v66_v51 }
  0xad   :  { %v96_v52 = vpop.xlane.xlu1 %95 }
  0xae   :  { %v94_v53 = vpop.xlane.xlu0 %93  ;;  %v142_v35 = vmul.f32 0.0078125, %v96_v52  ;;  %v264_v52 = vrot.slane %v135_v25, %v1046_v44  ;;  %v209_v25 = vsel %vm208_vm1, %v207_v50, %v202_v10 }
  0xaf   :  { %v141_v36 = vmul.f32 0.0078125, %v94_v53  ;;  %v214_v53 = vrot.slane %v127_v13, %v1046_v44  ;;  %v260_v13 = vsel %vm208_vm1, %v259_v22, %v255_v47  ;;  %v1085_v47 = vsub.s32 %v245_v37, %v1033_v34 }
  0xb0   :  { %v298_v42 = vrot.slane %v142_v35, %v1043_v43 }
  0xb1   :  { %v84_v54 = vpop.xlane.xlu1 %83  ;;  %v294_v14 = vrot.slane %v141_v36, %v1040_v41 }
  0xb2   :  { %v68_v55 = vpop.xlane.xlu0 %67  ;;  %v136_v17 = vmul.f32 0.0078125, %v84_v54 }
  0xb3   :  { %v128_v28 = vmul.f32 0.0078125, %v68_v55  ;;  %v299_v48 = vsel %vm208_vm1, %v298_v42, %v294_v14 }
  0xb4   :  { %v269_v33 = vrot.slane %v136_v17, %v1049_v29 }
  0xb5   :  { %v110_v56 = vpop.xlane.xlu1 %109  ;;  %v221_v45 = vrot.slane %v128_v28, %v1049_v29  ;;  %v265_v28 = vsel %vm215_vm2, %v264_v52, %v260_v13 }
  0xb6   :  { %v98_v57 = vpop.xlane.xlu0 %97  ;;  %v149_v62 = vmul.f32 0.0078125, %v110_v56  ;;  %v216_v56 = vsel %vm215_vm2, %v214_v53, %v209_v25  ;;  %v270_v22 = vsel %vm222_vm3, %v269_v33, %v265_v28 }
  0xb7   :  { %v143_v51 = vmul.f32 0.0078125, %v98_v57  ;;  %v1072_v57 = vsub.s32 %v238_v49, %v1033_v34  ;;  %v223_v10 = vsel %vm222_vm3, %v221_v45, %v216_v56 }
  0xb9   :  { %v70_v58 = vpop.xlane.xlu1 %69 }
  0xba   :  { %v112_v59 = vpop.xlane.xlu0 %111  ;;  %v129_v54 = vmul.f32 0.0078125, %v70_v58  ;;  %v303_v58 = vrot.slane %v143_v51, %v1046_v44 }
  0xbb   :  { %v150_v55 = vmul.f32 0.0078125, %v112_v59 }
  0xbd   :  { %v100_v60 = vpop.xlane.xlu1 %99  ;;  %v337_v36 = vrot.slane %v150_v55, %v1043_v43  ;;  %v304_v43 = vsel %vm215_vm2, %v303_v58, %v299_v48 }
  0xbe   :  { %v86_v61 = vpop.xlane.xlu0 %85  ;;  %v144_v18 = vmul.f32 0.0078125, %v100_v60  ;;  %v228_v60 = vrot.slane %v129_v54, %v1056_v46 }
  0xbf   :  { %v137_v59 = vmul.f32 0.0078125, %v86_v61  ;;  %v333_v61 = vrot.slane %v149_v62, %v1040_v41 }
  0xc0   :  { %v308_v49 = vrot.slane %v144_v18, %v1049_v29  ;;  %v230_v55 = vsel %vm229_vm4, %v228_v60, %v223_v10 }
  0xc1   :  { %v1029_v63 = vpop.xlane.xlu1 %71  ;;  %v274_v14 = vrot.slane %v137_v59, %v1056_v46  ;;  %v338_v41 = vsel %vm208_vm1, %v337_v36, %v333_v61 }
  0xc2   :  { %v1031_v32 = vpop.xlane.xlu0 %113  ;;  %v130_v50 = vmul.f32 0.0078125, %v1029_v63 }
  0xc3   :  { %v151_v51 = vmul.f32 0.0078125, %v1031_v32  ;;  %v275_v25 = vsel %vm229_vm4, %v274_v14, %v270_v22 }
  0xc5   :  { %v1035_v38 = vpop.xlane.xlu1 %101  ;;  %v342_v62 = vrot.slane %v151_v51, %v1046_v44 }
  0xc6   :  { %v1037_v39 = vpop.xlane.xlu0 %87  ;;  %v145_v52 = vmul.f32 0.0078125, %v1035_v38  ;;  %v309_v38 = vsel %vm222_vm3, %v308_v49, %v304_v43 }
  0xc7   :  { %v138_v53 = vmul.f32 0.0078125, %v1037_v39  ;;  %v235_v39 = vrot.slane %v130_v50, %v1069_v31 }
  0xc9   :  { %v1051_v30 = vpop.xlane.xlu1 %73  ;;  %v237_v22 = vsel %vm236_vm5, %v235_v39, %v230_v55 }
  0xca   :  { %v1053_v21 = vpop.xlane.xlu0 %115  ;;  %v131_v63 = vmul.f32 0.0078125, %v1051_v30 }
  0xcb   :  { %v152_v32 = vmul.f32 0.0078125, %v1053_v21 }
  0xcc   :  { %v242_v36 = vrot.slane %v131_v63, %v1072_v57 }
  0xcd   :  { %v104_v26 = vpop.xlane.xlu1 %103  ;;  %v347_v44 = vrot.slane %v152_v32, %v1049_v29 }
  0xce   :  { %v90_v40 = vpop.xlane.xlu0 %89  ;;  %v146_v18 = vmul.f32 0.0078125, %v104_v26  ;;  %v313_v26 = vrot.slane %v145_v52, %v1056_v46 }
  0xcf   :  { %v139_v42 = vmul.f32 0.0078125, %v90_v40  ;;  %v279_v40 = vrot.slane %v138_v53, %v1069_v31 }
  0xd0   :  { %v318_v59 = vrot.slane %v146_v18, %v1069_v31  ;;  %v314_v49 = vsel %vm229_vm4, %v313_v26, %v309_v38 }
  0xd1   :  { %v76_v35 = vpop.xlane.xlu1 %75  ;;  %v284_v28 = vrot.slane %v139_v42, %v1072_v57  ;;  %v280_v50 = vsel %vm236_vm5, %v279_v40, %v275_v25 }
  0xd2   :  { %v118_v17 = vpop.xlane.xlu0 %117  ;;  %v132_v30 = vmul.f32 0.0078125, %v76_v35  ;;  %v343_v35 = vsel %vm215_vm2, %v342_v62, %v338_v41  ;;  %v319_v52 = vsel %vm236_vm5, %v318_v59, %v314_v49 }
  0xd3   :  { %v153_v13 = vmul.f32 0.0078125, %v118_v17  ;;  %v285_v53 = vsel %vm243_vm6, %v284_v28, %v280_v50  ;;  %v348_v55 = vsel %vm222_vm3, %v347_v44, %v343_v35  ;;  %v603_v35 = vsub.s32 2, %v1033_v34 }
  0xd4   :  { %v249_v51 = vrot.slane %v132_v30, %v1085_v47 }
  0xd5   :  { %v106_v54 = vpop.xlane.xlu1 %105  ;;  %v352_v10 = vrot.slane %v153_v13, %v1056_v46  ;;  %v244_v46 = vsel %vm243_vm6, %v242_v36, %v237_v22  ;;  %v533_v36 = vsub.s32 0, %v1033_v34 }
  0xd6   :  { %v92_v37 = vpop.xlane.xlu0 %91  ;;  %v147_v33 = vmul.f32 0.0078125, %v106_v54 }
  0xd7   :  { %v140_v45 = vmul.f32 0.0078125, %v92_v37  ;;  %v353_v42 = vsel %vm229_vm4, %v352_v10, %v348_v55 }
  0xd8   :  { %v323_v17 = vrot.slane %v147_v33, %v1072_v57  ;;  %v251_v33 = vsel %vm250_vm7, %v249_v51, %v244_v46 }
  0xd9   :  { %v108_v58 = vpop.xlane.xlu1 %107  ;;  %v289_v48 = vrot.slane %v140_v45, %v1085_v47 }
  0xda   :  { %v120_v21 = vpop.xlane.xlu0 %119  ;;  %v148_v56 = vmul.f32 0.0078125, %v108_v58  ;;  %v324_v41 = vsel %vm243_vm6, %v323_v17, %v319_v52 }
  0xdb   :  { %v154_v60 = vmul.f32 0.0078125, %v120_v21  ;;  %v290_v18 = vsel %vm250_vm7, %v289_v48, %v285_v53  ;;  %v568_v48 = vsub.s32 1, %v1033_v34 }
  0xdc   :  { %v328_v61 = vrot.slane %v148_v56, %v1085_v47  ;;  %v370_v39 = vsel %vm369_vm8, %v290_v18, %v251_v33 }
  0xdd   :  { %v357_v29 = vrot.slane %v154_v60, %v1069_v31  ;;  %v124_v14 = vpop.xlane.xlu1 %123 }
  0xde   :  { %v122_v43 = vpop.xlane.xlu0 %121  ;;  %v156_v37 = vmul.f32 0.0078125, %v124_v14  ;;  %v329_v31 = vsel %vm250_vm7, %v328_v61, %v324_v41  ;;  %v638_v61 = vsub.s32 3, %v1033_v34 }
  0xdf   :  { %v155_v54 = vmul.f32 0.0078125, %v122_v43  ;;  %v358_v45 = vsel %vm236_vm5, %v357_v29, %v353_v42  ;;  %v372_v13 = vsel %vm371_vm9, %v329_v31, %v370_v39 }
  0xe0   :  { %v367_v32 = vrot.slane %v156_v37, %v1085_v47  ;;  %v450_v47 = vld [vmem:[%s1194_s2 + $0x8] sm:$0xff] }
  0xe1   :  { %v362_v63 = vrot.slane %v155_v54, %v1072_v57  ;;  %v449_v57 = vld [vmem:[%s1194_s2] sm:$0xff]  ;;  %s873_s2 = smov [#allocation5]  }
  0xe2   :  { %v806_v26 = vpack.c.bf16 %v450_v47, %v449_v57  ;;  %v1222_v57 = vld [vmem:[#allocation12_spill] sm:$0xff]  ;;  %s740_s17 = sshll.u32 %s873_s2, 4  ;;  %s741_s17 = int_to_ptr.vmem [resolvable:$true] %s740_s17 }
  0xe3   :  { %v363_v38 = vsel %vm243_vm6, %v362_v63, %v358_v45  ;;  %s841_s18 = scalar_lea.vmem %s741_s17, 4096  ;;  %p846_p9 = scmp.lt.s32.totalorder %s741_s17, %s741_s17 }
  0xe4   :  { %v368_v62 = vsel %vm250_vm7, %v367_v32, %v363_v38  ;;  %807 = vmatpush3.bf16.msra.mxu1 %v806_v26  ;;  %v1223_v26 = vld [vmem:[#allocation10_spill] sm:$0xff]  ;;  %p842_p8 = scmp.ne.s32.totalorder %s741_s17, %s841_s18  ;;  %p847_p10 = scmp.lt.s32.totalorder %s841_s18, %s841_s18 }
  0xe5   :  { %v374_v25 = vsel %vm373_vm10, %v368_v62, %v372_v13 }
  0xe6   :  { %784 = vmatmul.mubr.msk.f32.vlgmr.msra.gmra.mrb[0].mxu0 %vm375_vm11, %v374_v25  ;;  %p848_p11 = por %p847_p10, %p846_p9 }
  0xe8   :  { %p849_p12 = pnand %p848_p11, %p842_p8 }
 0x1b9   :  { %v444_v40 = vpop.f32.mrb[0].mxu0 }
 0x1ba   :  { %v448_v30 = vmax.f32 %v444_v40, 0.0  ;;  %v785_v58 = vpop.f32.mrb[1].mxu0 }
 0x1bc   :  { %791 = vmatmul.mubr.msk.f32.vlgmr.msra.gmra.mrb[0].mxu1 %vm451_vm12, %v448_v30  ;;  %v1224_v30 = vld [vmem:[#allocation16_spill] sm:$0xff] }
 0x28f   :  { %v521_v21 = vpop.f32.mrb[0].mxu1 }
 0x290   :  { %v754_v59 = vmul.f32 -1.442695, %v521_v21  ;;  %v792_v28 = vpop.f32.mrb[1].mxu1  ;;  %v1225_v21 = vld [vmem:[#allocation14_spill] sm:$0xff] }
 0x291   :  { %v1226_v28 = vld [vmem:[#allocation8_spill] sm:$0xff] }
 0x292   :  { %815 = vpow2.f32 %v754_v59 }
 0x29c   :  { %v816_v56 = vpop.eup %815 }
 0x29d   :  { %v528_v60 = vadd.f32 1.0, %v816_v56 }
 0x29f   :  { %817 = vrcp.f32 %v528_v60 }
 0x2a9   :  { %v818_v44 = vpop.eup %817 }
 0x2aa   :  { %v534_v17 = vrot.slane %v818_v44, %v533_v36  ;;  %v569_v22 = vrot.slane %v818_v44, %v568_v48  ;;  %v604_v10 = vrot.slane %v818_v44, %v603_v35  ;;  %v639_v49 = vrot.slane %v818_v44, %v638_v61  ;;  %v1227_v36 = vld [vmem:[#allocation17_spill] sm:$0xff] }
 0x2ac   :  { %540 = vbcast.lane.b32.xlu1 %v534_v17, 264  ;;  %536 = vbcast.lane.b32.xlu0 %v534_v17, 256 }
 0x2b0   :  { %544 = vbcast.lane.b32.xlu1 %v534_v17, 272  ;;  %552 = vbcast.lane.b32.xlu0 %v534_v17, 288 }
 0x2b4   :  { %548 = vbcast.lane.b32.xlu1 %v534_v17, 280  ;;  %560 = vbcast.lane.b32.xlu0 %v534_v17, 304 }
 0x2b8   :  { %556 = vbcast.lane.b32.xlu1 %v534_v17, 296  ;;  %571 = vbcast.lane.b32.xlu0 %v569_v22, 256 }
 0x2bc   :  { %564 = vbcast.lane.b32.xlu1 %v534_v17, 312  ;;  %579 = vbcast.lane.b32.xlu0 %v569_v22, 272  ;;  %v1228_v17 = vld [vmem:[#allocation11_spill] sm:$0xff] }
 0x2c0   :  { %575 = vbcast.lane.b32.xlu1 %v569_v22, 264  ;;  %587 = vbcast.lane.b32.xlu0 %v569_v22, 288 }
 0x2c4   :  { %583 = vbcast.lane.b32.xlu1 %v569_v22, 280  ;;  %595 = vbcast.lane.b32.xlu0 %v569_v22, 304 }
 0x2c8   :  { %591 = vbcast.lane.b32.xlu1 %v569_v22, 296  ;;  %606 = vbcast.lane.b32.xlu0 %v604_v10, 256 }
 0x2cc   :  { %599 = vbcast.lane.b32.xlu1 %v569_v22, 312  ;;  %614 = vbcast.lane.b32.xlu0 %v604_v10, 272 }
 0x2d0   :  { %610 = vbcast.lane.b32.xlu1 %v604_v10, 264  ;;  %622 = vbcast.lane.b32.xlu0 %v604_v10, 288 }
 0x2d4   :  { %618 = vbcast.lane.b32.xlu1 %v604_v10, 280  ;;  %630 = vbcast.lane.b32.xlu0 %v604_v10, 304 }
 0x2d8   :  { %626 = vbcast.lane.b32.xlu1 %v604_v10, 296  ;;  %641 = vbcast.lane.b32.xlu0 %v639_v49, 256 }
 0x2dc   :  { %634 = vbcast.lane.b32.xlu1 %v604_v10, 312  ;;  %649 = vbcast.lane.b32.xlu0 %v639_v49, 272  ;;  %v1229_v10 = vld [vmem:[#allocation9_spill] sm:$0xff] }
 0x2e0   :  { %645 = vbcast.lane.b32.xlu1 %v639_v49, 264  ;;  %657 = vbcast.lane.b32.xlu0 %v639_v49, 288 }
 0x2e4   :  { %653 = vbcast.lane.b32.xlu1 %v639_v49, 280  ;;  %665 = vbcast.lane.b32.xlu0 %v639_v49, 304 }
 0x2e8   :  { %661 = vbcast.lane.b32.xlu1 %v639_v49, 296 }
 0x2ec   :  { %669 = vbcast.lane.b32.xlu1 %v639_v49, 312  ;;  %v1230_v49 = vld [vmem:[#allocation15_spill] sm:$0xff] }
 0x31e   :  { %v541_v50 = vpop.permute.xlu1 %540  ;;  %v537_v51 = vpop.permute.xlu0 %536 }
 0x31f   :  { %v672_v29 = vmul.f32 %v541_v50, %v917_v3  ;;  %v671_v43 = vmul.f32 %v537_v51, %v911_v1 }
 0x321   :  { %704 = vst [vmem:[#allocation5 + $0x8] sm:$0xff] %v672_v29  ;;  %703 = vst [vmem:[#allocation5] sm:$0xff] %v671_v43  ;;  %v1231_v43 = vld [vmem:[#allocation13_spill] sm:$0xff] }
 0x322   :  { %v545_v34 = vpop.permute.xlu1 %544  ;;  %v553_v14 = vpop.permute.xlu0 %552 }
 0x323   :  { %v673_v52 = vmul.f32 %v545_v34, %v923_v5  ;;  %v675_v53 = vmul.f32 %v553_v14, %v945_v12  ;;  %v1232_v14 = vld [vmem:[#allocation19_spill] sm:$0xff] }
 0x325   :  { %705 = vst [vmem:[#allocation5 + $0x10] sm:$0xff] %v673_v52  ;;  %707 = vst [vmem:[#allocation5 + $0x20] sm:$0xff] %v675_v53 }
 0x326   :  { %v549_v54 = vpop.permute.xlu1 %548  ;;  %v561_v37 = vpop.permute.xlu0 %560 }
 0x327   :  { %v674_v46 = vmul.f32 %v549_v54, %v935_v9  ;;  %v677_v55 = vmul.f32 %v561_v37, %v969_v20  ;;  %v1233_v54 = vld [vmem:[#allocation18_spill] sm:$0xff] }
 0x329   :  { %706 = vst [vmem:[#allocation5 + $0x18] sm:$0xff] %v674_v46  ;;  %709 = vst [vmem:[#allocation5 + $0x30] sm:$0xff] %v677_v55  ;;  %v1234_v55 = vld [vmem:[#allocation20_spill] sm:$0xff] }
 0x32a   :  { %v557_v3 = vpop.permute.xlu1 %556  ;;  %v572_v1 = vpop.permute.xlu0 %571 }
 0x32b   :  { %v676_v41 = vmul.f32 %v557_v3, %v957_v16  ;;  %v679_v18 = vmul.f32 %v572_v1, %v909_v0 }
 0x32d   :  { %708 = vst [vmem:[#allocation5 + $0x28] sm:$0xff] %v676_v41  ;;  %711 = vst [vmem:[#allocation5 + $0x40] sm:$0xff] %v679_v18 }
 0x32e   :  { %v565_v5 = vpop.permute.xlu1 %564  ;;  %v580_v12 = vpop.permute.xlu0 %579 }
 0x32f   :  { %v678_v42 = vmul.f32 %v565_v5, %v981_v24  ;;  %v681_v31 = vmul.f32 %v580_v12, %v921_v4 }
 0x331   :  { %710 = vst [vmem:[#allocation5 + $0x38] sm:$0xff] %v678_v42  ;;  %713 = vst [vmem:[#allocation5 + $0x50] sm:$0xff] %v681_v31 }
 0x332   :  { %v576_v9 = vpop.permute.xlu1 %575  ;;  %v588_v20 = vpop.permute.xlu0 %587 }
 0x333   :  { %v680_v63 = vmul.f32 %v576_v9, %v915_v2  ;;  %v683_v32 = vmul.f32 %v588_v20, %v953_v15 }
 0x335   :  { %712 = vst [vmem:[#allocation5 + $0x48] sm:$0xff] %v680_v63  ;;  %715 = vst [vmem:[#allocation5 + $0x60] sm:$0xff] %v683_v32 }
 0x336   :  { %v584_v16 = vpop.permute.xlu1 %583  ;;  %v596_v0 = vpop.permute.xlu0 %595 }
 0x337   :  { %v682_v33 = vmul.f32 %v584_v16, %v933_v8  ;;  %v685_v45 = vmul.f32 %v596_v0, %v977_v23 }
 0x339   :  { %714 = vst [vmem:[#allocation5 + $0x58] sm:$0xff] %v682_v33  ;;  %717 = vst [vmem:[#allocation5 + $0x70] sm:$0xff] %v685_v45 }
 0x33a   :  { %v592_v24 = vpop.permute.xlu1 %591  ;;  %v607_v4 = vpop.permute.xlu0 %606 }
 0x33b   :  { %v684_v38 = vmul.f32 %v592_v24, %v965_v19  ;;  %v687_v39 = vmul.f32 %v607_v4, %v929_v7 }
 0x33d   :  { %716 = vst [vmem:[#allocation5 + $0x68] sm:$0xff] %v684_v38  ;;  %719 = vst [vmem:[#allocation5 + $0x80] sm:$0xff] %v687_v39 }
 0x33e   :  { %v600_v2 = vpop.permute.xlu1 %599  ;;  %v615_v15 = vpop.permute.xlu0 %614 }
 0x33f   :  { %v686_v62 = vmul.f32 %v600_v2, %v989_v27  ;;  %v689_v13 = vmul.f32 %v615_v15, %v941_v11 }
 0x341   :  { %718 = vst [vmem:[#allocation5 + $0x78] sm:$0xff] %v686_v62  ;;  %721 = vst [vmem:[#allocation5 + $0x90] sm:$0xff] %v689_v13 }
 0x342   :  { %v611_v8 = vpop.permute.xlu1 %610  ;;  %v623_v23 = vpop.permute.xlu0 %622 }
 0x343   :  { %v688_v25 = vmul.f32 %v611_v8, %v927_v6  ;;  %v691_v47 = vmul.f32 %v623_v23, %v1222_v57 }
 0x345   :  { %720 = vst [vmem:[#allocation5 + $0x88] sm:$0xff] %v688_v25  ;;  %723 = vst [vmem:[#allocation5 + $0xa0] sm:$0xff] %v691_v47 }
 0x346   :  { %v619_v19 = vpop.permute.xlu1 %618  ;;  %v631_v7 = vpop.permute.xlu0 %630 }
 0x347   :  { %v690_v40 = vmul.f32 %v619_v19, %v1223_v26  ;;  %v693_v58 = vmul.f32 %v631_v7, %v1224_v30 }
 0x349   :  { %722 = vst [vmem:[#allocation5 + $0x98] sm:$0xff] %v690_v40  ;;  %725 = vst [vmem:[#allocation5 + $0xb0] sm:$0xff] %v693_v58 }
 0x34a   :  { %v627_v27 = vpop.permute.xlu1 %626  ;;  %v642_v11 = vpop.permute.xlu0 %641 }
 0x34b   :  { %v692_v59 = vmul.f32 %v627_v27, %v1225_v21  ;;  %v695_v56 = vmul.f32 %v642_v11, %v1226_v28 }
 0x34d   :  { %724 = vst [vmem:[#allocation5 + $0xa8] sm:$0xff] %v692_v59  ;;  %727 = vst [vmem:[#allocation5 + $0xc0] sm:$0xff] %v695_v56 }
 0x34e   :  { %v635_v6 = vpop.permute.xlu1 %634  ;;  %v650_v60 = vpop.permute.xlu0 %649 }
 0x34f   :  { %v694_v44 = vmul.f32 %v635_v6, %v1227_v36  ;;  %v697_v48 = vmul.f32 %v650_v60, %v1228_v17 }
 0x351   :  { %726 = vst [vmem:[#allocation5 + $0xb8] sm:$0xff] %v694_v44  ;;  %729 = vst [vmem:[#allocation5 + $0xd0] sm:$0xff] %v697_v48 }
 0x352   :  { %v646_v22 = vpop.permute.xlu1 %645  ;;  %v658_v35 = vpop.permute.xlu0 %657 }
 0x353   :  { %v696_v61 = vmul.f32 %v646_v22, %v1229_v10  ;;  %v699_v50 = vmul.f32 %v658_v35, %v1230_v49 }
 0x355   :  { %728 = vst [vmem:[#allocation5 + $0xc8] sm:$0xff] %v696_v61  ;;  %731 = vst [vmem:[#allocation5 + $0xe0] sm:$0xff] %v699_v50 }
 0x356   :  { %v654_v51 = vpop.permute.xlu1 %653  ;;  %v666_v29 = vpop.permute.xlu0 %665 }
 0x357   :  { %v698_v34 = vmul.f32 %v654_v51, %v1231_v43  ;;  %v701_v52 = vmul.f32 %v666_v29, %v1232_v14 }
 0x359   :  { %730 = vst [vmem:[#allocation5 + $0xd8] sm:$0xff] %v698_v34  ;;  %733 = vst [vmem:[#allocation5 + $0xf0] sm:$0xff] %v701_v52 }
 0x35a   :  { %v662_v53 = vpop.permute.xlu1 %661 }
 0x35b   :  { %v700_v37 = vmul.f32 %v662_v53, %v1233_v54 }
 0x35d   :  { %732 = vst [vmem:[#allocation5 + $0xe8] sm:$0xff] %v700_v37 }
 0x35e   :  { %v670_v46 = vpop.permute.xlu1 %669 }
 0x35f   :  { %v702_v3 = vmul.f32 %v670_v46, %v1234_v55 }
 0x361   :  { %734 = vst [vmem:[#allocation5 + $0xf8] sm:$0xff] %v702_v3 }
 0x362   :  { %852 = shalt.err (!%p849_p12)
}
 0x363   :  { %s853_s21 = scalar_lea.hbm %s1195_s3, 4096 }
 0x364   :  { %p854_p13 = scmp.ne.s32.totalorder %s1195_s3, %s853_s21  ;;  %p857_p0 = scmp.lt.u32.totalorder %s853_s21, %s1195_s3 }
 0x366   :  { %p859_p1 = pnand %p857_p0, %p854_p13 }
 0x368   :  { %862 = shalt.err (!%p859_p1)
}
 0x369   :  { %746 = dma.vmem_to_hbm [thread:$0]  %s741_s17, 4096, %s1195_s3, [#allocation4], %s868_s22, %s868_s22, %s869_s23  }
 0x36a   :  { %865 = dma.done.wait [#allocation4], 4096  }
 0x36b   :  { %866 = vsyncadd [#allocation4], 4294963200 }
 0x36c   :  { %750 = vsyncpa [#allocation3], 1 }
 0x36d   :  { %751 = vsyncpa [#allocation4], 1 }

</bundles_post_ra>
